<compile_context>
chip_gen: v7x
topology: tpu7x:2x2x1
jax: 0.10.0
libtpu: 0.0.40
codegen_flags: <defaults>
</compile_context>

<pallas_src>
import jax
import jax.numpy as jnp
from jax.experimental import pallas as pl
from jax.experimental.pallas import tpu as pltpu


def _lstm_gadget_kernel(x_ref,       # (T*Bp, D_in)  time-major, batch-padded
                        w_ih_ref,    # (D_in, 4H)    LSTM input weights (transposed)
                        w_hh_ref,    # (H, 4H)       LSTM hidden weights (transposed)
                        b_lstm_ref,  # (1, 4H) f32   b_ih + b_hh
                        w_gad_ref,   # (H, 4H)       [W_LC | W_forget | W_input | W_output]^T
                        b_gad_ref,   # (1, 4H) f32
                        w_ne_ref,    # (H, H)        W_NE^T
                        b_ne_ref,    # (1, H)  f32
                        w_out_ref,   # (1, H)  f32   output_layer weight row
                        b_out_ref,   # (1, 1)  f32
                        slab_ref):   # (Bp, W_slab) f32 packed output
    H = w_hh_ref.shape[0]
    Bp = slab_ref.shape[0]
    T = x_ref.shape[0] // Bp
    mm_dtype = w_hh_ref.dtype        # f32 or bf16 matmul operand dtype

    # Deterministic padding lanes in the packed output slab.
    slab_ref[...] = jnp.zeros_like(slab_ref)

    # Hoisted input projection (bias folded in): one matmul for all time
    # steps, kept in vregs (T*Bp x 4H f32 = 8 vregs at the test size).
    pre = (jnp.dot(x_ref[...], w_ih_ref[...],
                   preferred_element_type=jnp.float32) + b_lstm_ref[...])

    w_hh = w_hh_ref[...]
    h = jnp.zeros((Bp, H), jnp.float32)
    c = jnp.zeros((Bp, H), jnp.float32)

    # Fully unrolled recurrence with h/c as register carries; only
    # h @ W_hh sits on the serial chain.  PyTorch gate order: i, f, g, o.
    for t in range(T):
        gates = pre[t * Bp:(t + 1) * Bp, :] + jnp.dot(
            h.astype(mm_dtype), w_hh, preferred_element_type=jnp.float32)
        sig = jax.nn.sigmoid(gates)                  # one full-width EUP pass
        g_g = jnp.tanh(gates[:, 2 * H:3 * H])        # tanh only on the g slice
        c = sig[:, 1 * H:2 * H] * c + sig[:, 0 * H:1 * H] * g_g   # f*c + i*g
        h = sig[:, 3 * H:4 * H] * jnp.tanh(c)                     # o*tanh(c)

    # LC-NE gadget on the final hidden state (one-shot epilogue).
    gad = (jnp.dot(h.astype(mm_dtype), w_gad_ref[...],
                   preferred_element_type=jnp.float32) + b_gad_ref[...])
    gad_sig = jax.nn.sigmoid(gad)                    # full-width; slice f/i/o
    LC_t = jnp.tanh(gad[:, 0 * H:1 * H])
    f_s = gad_sig[:, 1 * H:2 * H]
    i_s = gad_sig[:, 2 * H:3 * H]
    o_s = gad_sig[:, 3 * H:4 * H]
    NE_t = jax.nn.sigmoid(
        jnp.dot(LC_t.astype(mm_dtype), w_ne_ref[...],
                preferred_element_type=jnp.float32) + b_ne_ref[...])

    modulated = f_s * h + i_s * NE_t
    # N=1 output matmul -> VPU multiply + XLU lane reduction (MXU stays idle).
    out_col = (jnp.sum(modulated * w_out_ref[...], axis=-1, keepdims=True)
               + b_out_ref[...])

    # Direct slab writes (no lane concatenate); HBM writeback is ONE
    # lane-dense (Bp, W_slab) DMA.
    slab_ref[:, 0 * H:1 * H] = LC_t
    slab_ref[:, 1 * H:2 * H] = NE_t
    slab_ref[:, 2 * H:3 * H] = f_s
    slab_ref[:, 3 * H:4 * H] = i_s
    slab_ref[:, 4 * H:5 * H] = o_s
    slab_ref[:, 5 * H:5 * H + 1] = out_col


def lstm_gadget_forward(x, params, *, use_bf16=False):
    """x: [B, T, D_in] float32 (batch_first, like PyTorch). Returns the 6-tuple.

    use_bf16: cast matmul weights (and x) to bf16 for native MXU passes; h/c,
    gate math and accumulation stay f32.
    """
    B, T, D_in = x.shape
    H = params["w_hh_t"].shape[0]
    Bp = ((B + 7) // 8) * 8                       # sublane multiple (f32: 8)
    W_slab = ((6 * H + 127) // 128) * 128         # lane-dense packed output

    x_tm = jnp.transpose(x, (1, 0, 2))            # time-major (T, B, D_in)
    if Bp != B:
        x_tm = jnp.pad(x_tm, ((0, 0), (0, Bp - B), (0, 0)))
    x2d = x_tm.reshape(T * Bp, D_in)

    mm_dtype = jnp.bfloat16 if use_bf16 else jnp.float32
    cast = lambda a: a.astype(mm_dtype)

    vmem = lambda: pl.BlockSpec(memory_space=pltpu.MemorySpace.VMEM)

    slab = pl.pallas_call(
        _lstm_gadget_kernel,
        out_shape=jax.ShapeDtypeStruct((Bp, W_slab), jnp.float32),
        in_specs=[vmem() for _ in range(10)],
        out_specs=vmem(),
    )(cast(x2d),
      cast(params["w_ih_t"]), cast(params["w_hh_t"]), params["b_lstm"],
      cast(params["w_gad_t"]), params["b_gad"],
      cast(params["w_ne_t"]), params["b_ne"],
      params["w_out_row"], params["b_out"])

    LC = slab[:B, 0 * H:1 * H]
    NE = slab[:B, 1 * H:2 * H]
    f_s = slab[:B, 2 * H:3 * H]
    i_s = slab[:B, 3 * H:4 * H]
    o_s = slab[:B, 4 * H:5 * H]
    out = slab[:B, 5 * H:5 * H + 1]
    return out, LC, NE, f_s, i_s, o_s


def init_params(key, input_dim, hidden_dim):
    """Deterministic synthetic parameters (PyTorch-style uniform init ranges)."""
    H = hidden_dim
    ks = jax.random.split(key, 16)
    u = lambda k, shape, bound: jax.random.uniform(
        k, shape, jnp.float32, minval=-bound, maxval=bound)

    s_lstm = 1.0 / jnp.sqrt(H)
    # PyTorch LSTM weights: weight_ih [4H, D_in], weight_hh [4H, H]; gate order i,f,g,o.
    w_ih = u(ks[0], (4 * H, input_dim), s_lstm)
    w_hh = u(ks[1], (4 * H, H), s_lstm)
    b_ih = u(ks[2], (4 * H,), s_lstm)
    b_hh = u(ks[3], (4 * H,), s_lstm)

    s_lin = 1.0 / jnp.sqrt(H)
    w_lc = u(ks[4], (H, H), s_lin); b_lc = u(ks[5], (H,), s_lin)
    w_ne = u(ks[6], (H, H), s_lin); b_ne = u(ks[7], (H,), s_lin)
    w_f = u(ks[8], (H, H), s_lin); b_f = u(ks[9], (H,), s_lin)
    w_i = u(ks[10], (H, H), s_lin); b_i = u(ks[11], (H,), s_lin)
    w_o = u(ks[12], (H, H), s_lin); b_o = u(ks[13], (H,), s_lin)
    w_out = u(ks[14], (1, H), s_lin); b_out = u(ks[15], (1,), s_lin)

    params = {
        "w_ih_t": w_ih.T,                                     # (D_in, 4H)
        "w_hh_t": w_hh.T,                                     # (H, 4H)
        "b_lstm": (b_ih + b_hh).reshape(1, 4 * H),            # (1, 4H)
        # gadget gates acting on h_n, stacked: [LC | forget | input | output]
        "w_gad_t": jnp.concatenate([w_lc.T, w_f.T, w_i.T, w_o.T], axis=1),  # (H, 4H)
        "b_gad": jnp.concatenate([b_lc, b_f, b_i, b_o]).reshape(1, 4 * H),  # (1, 4H)
        "w_ne_t": w_ne.T,                                     # (H, H)
        "b_ne": b_ne.reshape(1, H),                           # (1, H)
        "w_out_row": w_out,                                   # (1, H)
        "b_out": b_out.reshape(1, 1),                         # (1, 1)
    }
    return params


def reference_forward(x, params):
    """Plain-JAX reference (mirrors PyTorch semantics) for verification."""
    B, T, _ = x.shape
    H = params["w_hh_t"].shape[0]
    h = jnp.zeros((B, H), jnp.float32)
    c = jnp.zeros((B, H), jnp.float32)
    for t in range(T):
        g = x[:, t, :] @ params["w_ih_t"] + h @ params["w_hh_t"] + params["b_lstm"]
        i_g = jax.nn.sigmoid(g[:, 0 * H:1 * H])
        f_g = jax.nn.sigmoid(g[:, 1 * H:2 * H])
        g_g = jnp.tanh(g[:, 2 * H:3 * H])
        o_g = jax.nn.sigmoid(g[:, 3 * H:4 * H])
        c = f_g * c + i_g * g_g
        h = o_g * jnp.tanh(c)
    gad = h @ params["w_gad_t"] + params["b_gad"]
    LC = jnp.tanh(gad[:, 0 * H:1 * H])
    f_s = jax.nn.sigmoid(gad[:, 1 * H:2 * H])
    i_s = jax.nn.sigmoid(gad[:, 2 * H:3 * H])
    o_s = jax.nn.sigmoid(gad[:, 3 * H:4 * H])
    NE = jax.nn.sigmoid(LC @ params["w_ne_t"] + params["b_ne"])
    mod = f_s * h + i_s * NE
    out = mod @ params["w_out_row"].T + params["b_out"]
    return out, LC, NE, f_s, i_s, o_s


if __name__ == "__main__":
    B, T, D_IN, H = 2, 8, 16, 32

    key = jax.random.PRNGKey(0)
    k_x, k_p = jax.random.split(key)
    x = jax.random.normal(k_x, (B, T, D_IN), jnp.float32)
    params = init_params(k_p, D_IN, H)

    refs = reference_forward(x, params)

    # f32 path: exact check against the plain-JAX reference.
    outs = jax.block_until_ready(lstm_gadget_forward(x, params))
    for got, want in zip(outs, refs):
        assert got.shape == want.shape, (got.shape, want.shape)
        assert jnp.allclose(got, want, atol=1e-5, rtol=1e-5), float(
            jnp.max(jnp.abs(got - want)))

    # bf16 matmul-weight path (native MXU dtype on v5e/v6e/v7x); loose check
    # since weights/x are bf16-rounded while h/c and accumulation stay f32.
    outs_bf16 = jax.block_until_ready(lstm_gadget_forward(x, params, use_bf16=True))
    for got, want in zip(outs_bf16, refs):
        assert got.shape == want.shape, (got.shape, want.shape)
        assert jnp.allclose(got, want, atol=1e-1, rtol=1e-1), float(
            jnp.max(jnp.abs(got - want)))

    print("KERNEL_OK")
</pallas_src>

<mosaic_0001>
module attributes {stable_mosaic.version = 11 : i64} {
  func.func @_lstm_gadget_kernel(%arg0: memref<64x16xf32, #tpu.memory_space<vmem>>, %arg1: memref<16x128xf32, #tpu.memory_space<vmem>>, %arg2: memref<32x128xf32, #tpu.memory_space<vmem>>, %arg3: memref<1x128xf32, #tpu.memory_space<vmem>>, %arg4: memref<32x128xf32, #tpu.memory_space<vmem>>, %arg5: memref<1x128xf32, #tpu.memory_space<vmem>>, %arg6: memref<32x32xf32, #tpu.memory_space<vmem>>, %arg7: memref<1x32xf32, #tpu.memory_space<vmem>>, %arg8: memref<1x32xf32, #tpu.memory_space<vmem>>, %arg9: memref<1x1xf32, #tpu.memory_space<vmem>>, %arg10: memref<8x256xf32, #tpu.memory_space<vmem>>) attributes {dimension_semantics = [], scalar_prefetch = 0 : i64, scratch_operands = 0 : i64, tpu.core_type = #tpu.core_type<tc>} {
    %cst = arith.constant 0.000000e+00 : f32
    %0 = vector.broadcast %cst : f32 to vector<8x256xf32>
    %c0 = arith.constant 0 : index
    %c0_0 = arith.constant 0 : index
    %1 = vector.load %arg10[%c0, %c0_0] : memref<8x256xf32, #tpu.memory_space<vmem>>, vector<8x256xf32>
    tpu.vector_store %arg10[%c0, %c0_0], %0 {strides = array<i32>} : memref<8x256xf32, #tpu.memory_space<vmem>>, vector<8x256xf32>,
    %c0_1 = arith.constant 0 : index
    %c0_2 = arith.constant 0 : index
    %2 = vector.load %arg0[%c0_1, %c0_2] : memref<64x16xf32, #tpu.memory_space<vmem>>, vector<64x16xf32>
    %c0_3 = arith.constant 0 : index
    %c0_4 = arith.constant 0 : index
    %3 = vector.load %arg1[%c0_3, %c0_4] : memref<16x128xf32, #tpu.memory_space<vmem>>, vector<16x128xf32>
    %cst_5 = arith.constant dense<0.000000e+00> : vector<64x128xf32>
    %4 = tpu.matmul %2, %3, %cst_5 {dimension_numbers = #tpu.dot_dimension_numbers<[1], [0], [0], [1], [0, 0, 1, 1], [], []>} : vector<64x16xf32>, vector<16x128xf32>, vector<64x128xf32> -> vector<64x128xf32>
    %c0_6 = arith.constant 0 : index
    %c0_7 = arith.constant 0 : index
    %5 = vector.load %arg3[%c0_6, %c0_7] : memref<1x128xf32, #tpu.memory_space<vmem>>, vector<1x128xf32>
    %6 = vector.broadcast %5 : vector<1x128xf32> to vector<64x128xf32>
    %7 = arith.addf %4, %6 : vector<64x128xf32>
    %c0_8 = arith.constant 0 : index
    %c0_9 = arith.constant 0 : index
    %8 = vector.load %arg2[%c0_8, %c0_9] : memref<32x128xf32, #tpu.memory_space<vmem>>, vector<32x128xf32>
    %cst_10 = arith.constant 0.000000e+00 : f32
    %9 = vector.broadcast %cst_10 : f32 to vector<8x32xf32>
    %cst_11 = arith.constant 0.000000e+00 : f32
    %10 = vector.broadcast %cst_11 : f32 to vector<8x32xf32>
    %11 = vector.extract_strided_slice %7 {offsets = [0, 0], sizes = [8, 128], strides = [1, 1]} : vector<64x128xf32> to vector<8x128xf32>
    %cst_12 = arith.constant dense<0.000000e+00> : vector<8x128xf32>
    %12 = tpu.matmul %9, %8, %cst_12 {dimension_numbers = #tpu.dot_dimension_numbers<[1], [0], [0], [1], [0, 0, 1, 1], [], []>} : vector<8x32xf32>, vector<32x128xf32>, vector<8x128xf32> -> vector<8x128xf32>
    %13 = arith.addf %11, %12 : vector<8x128xf32>
    %14 = arith.negf %13 : vector<8x128xf32>
    %15 = math.exp %14 : vector<8x128xf32>
    %cst_13 = arith.constant 1.000000e+00 : f32
    %16 = vector.broadcast %cst_13 : f32 to vector<8x128xf32>
    %17 = arith.addf %16, %15 : vector<8x128xf32>
    %18 = arith.divf %16, %17 : vector<8x128xf32>
    %19 = vector.extract_strided_slice %13 {offsets = [0, 64], sizes = [8, 32], strides = [1, 1]} : vector<8x128xf32> to vector<8x32xf32>
    %20 = math.tanh %19 : vector<8x32xf32>
    %21 = vector.extract_strided_slice %18 {offsets = [0, 32], sizes = [8, 32], strides = [1, 1]} : vector<8x128xf32> to vector<8x32xf32>
    %22 = arith.mulf %21, %10 : vector<8x32xf32>
    %23 = vector.extract_strided_slice %18 {offsets = [0, 0], sizes = [8, 32], strides = [1, 1]} : vector<8x128xf32> to vector<8x32xf32>
    %24 = arith.mulf %23, %20 : vector<8x32xf32>
    %25 = arith.addf %22, %24 : vector<8x32xf32>
    %26 = vector.extract_strided_slice %18 {offsets = [0, 96], sizes = [8, 32], strides = [1, 1]} : vector<8x128xf32> to vector<8x32xf32>
    %27 = math.tanh %25 : vector<8x32xf32>
    %28 = arith.mulf %26, %27 : vector<8x32xf32>
    %29 = vector.extract_strided_slice %7 {offsets = [8, 0], sizes = [8, 128], strides = [1, 1]} : vector<64x128xf32> to vector<8x128xf32>
    %cst_14 = arith.constant dense<0.000000e+00> : vector<8x128xf32>
    %30 = tpu.matmul %28, %8, %cst_14 {dimension_numbers = #tpu.dot_dimension_numbers<[1], [0], [0], [1], [0, 0, 1, 1], [], []>} : vector<8x32xf32>, vector<32x128xf32>, vector<8x128xf32> -> vector<8x128xf32>
    %31 = arith.addf %29, %30 : vector<8x128xf32>
    %32 = arith.negf %31 : vector<8x128xf32>
    %33 = math.exp %32 : vector<8x128xf32>
    %cst_15 = arith.constant 1.000000e+00 : f32
    %34 = vector.broadcast %cst_15 : f32 to vector<8x128xf32>
    %35 = arith.addf %34, %33 : vector<8x128xf32>
    %36 = arith.divf %34, %35 : vector<8x128xf32>
    %37 = vector.extract_strided_slice %31 {offsets = [0, 64], sizes = [8, 32], strides = [1, 1]} : vector<8x128xf32> to vector<8x32xf32>
    %38 = math.tanh %37 : vector<8x32xf32>
    %39 = vector.extract_strided_slice %36 {offsets = [0, 32], sizes = [8, 32], strides = [1, 1]} : vector<8x128xf32> to vector<8x32xf32>
    %40 = arith.mulf %39, %25 : vector<8x32xf32>
    %41 = vector.extract_strided_slice %36 {offsets = [0, 0], sizes = [8, 32], strides = [1, 1]} : vector<8x128xf32> to vector<8x32xf32>
    %42 = arith.mulf %41, %38 : vector<8x32xf32>
    %43 = arith.addf %40, %42 : vector<8x32xf32>
    %44 = vector.extract_strided_slice %36 {offsets = [0, 96], sizes = [8, 32], strides = [1, 1]} : vector<8x128xf32> to vector<8x32xf32>
    %45 = math.tanh %43 : vector<8x32xf32>
    %46 = arith.mulf %44, %45 : vector<8x32xf32>
    %47 = vector.extract_strided_slice %7 {offsets = [16, 0], sizes = [8, 128], strides = [1, 1]} : vector<64x128xf32> to vector<8x128xf32>
    %cst_16 = arith.constant dense<0.000000e+00> : vector<8x128xf32>
    %48 = tpu.matmul %46, %8, %cst_16 {dimension_numbers = #tpu.dot_dimension_numbers<[1], [0], [0], [1], [0, 0, 1, 1], [], []>} : vector<8x32xf32>, vector<32x128xf32>, vector<8x128xf32> -> vector<8x128xf32>
    %49 = arith.addf %47, %48 : vector<8x128xf32>
    %50 = arith.negf %49 : vector<8x128xf32>
    %51 = math.exp %50 : vector<8x128xf32>
    %cst_17 = arith.constant 1.000000e+00 : f32
    %52 = vector.broadcast %cst_17 : f32 to vector<8x128xf32>
    %53 = arith.addf %52, %51 : vector<8x128xf32>
    %54 = arith.divf %52, %53 : vector<8x128xf32>
    %55 = vector.extract_strided_slice %49 {offsets = [0, 64], sizes = [8, 32], strides = [1, 1]} : vector<8x128xf32> to vector<8x32xf32>
    %56 = math.tanh %55 : vector<8x32xf32>
    %57 = vector.extract_strided_slice %54 {offsets = [0, 32], sizes = [8, 32], strides = [1, 1]} : vector<8x128xf32> to vector<8x32xf32>
    %58 = arith.mulf %57, %43 : vector<8x32xf32>
    %59 = vector.extract_strided_slice %54 {offsets = [0, 0], sizes = [8, 32], strides = [1, 1]} : vector<8x128xf32> to vector<8x32xf32>
    %60 = arith.mulf %59, %56 : vector<8x32xf32>
    %61 = arith.addf %58, %60 : vector<8x32xf32>
    %62 = vector.extract_strided_slice %54 {offsets = [0, 96], sizes = [8, 32], strides = [1, 1]} : vector<8x128xf32> to vector<8x32xf32>
    %63 = math.tanh %61 : vector<8x32xf32>
    %64 = arith.mulf %62, %63 : vector<8x32xf32>
    %65 = vector.extract_strided_slice %7 {offsets = [24, 0], sizes = [8, 128], strides = [1, 1]} : vector<64x128xf32> to vector<8x128xf32>
    %cst_18 = arith.constant dense<0.000000e+00> : vector<8x128xf32>
    %66 = tpu.matmul %64, %8, %cst_18 {dimension_numbers = #tpu.dot_dimension_numbers<[1], [0], [0], [1], [0, 0, 1, 1], [], []>} : vector<8x32xf32>, vector<32x128xf32>, vector<8x128xf32> -> vector<8x128xf32>
    %67 = arith.addf %65, %66 : vector<8x128xf32>
    %68 = arith.negf %67 : vector<8x128xf32>
    %69 = math.exp %68 : vector<8x128xf32>
    %cst_19 = arith.constant 1.000000e+00 : f32
    %70 = vector.broadcast %cst_19 : f32 to vector<8x128xf32>
    %71 = arith.addf %70, %69 : vector<8x128xf32>
    %72 = arith.divf %70, %71 : vector<8x128xf32>
    %73 = vector.extract_strided_slice %67 {offsets = [0, 64], sizes = [8, 32], strides = [1, 1]} : vector<8x128xf32> to vector<8x32xf32>
    %74 = math.tanh %73 : vector<8x32xf32>
    %75 = vector.extract_strided_slice %72 {offsets = [0, 32], sizes = [8, 32], strides = [1, 1]} : vector<8x128xf32> to vector<8x32xf32>
    %76 = arith.mulf %75, %61 : vector<8x32xf32>
    %77 = vector.extract_strided_slice %72 {offsets = [0, 0], sizes = [8, 32], strides = [1, 1]} : vector<8x128xf32> to vector<8x32xf32>
    %78 = arith.mulf %77, %74 : vector<8x32xf32>
    %79 = arith.addf %76, %78 : vector<8x32xf32>
    %80 = vector.extract_strided_slice %72 {offsets = [0, 96], sizes = [8, 32], strides = [1, 1]} : vector<8x128xf32> to vector<8x32xf32>
    %81 = math.tanh %79 : vector<8x32xf32>
    %82 = arith.mulf %80, %81 : vector<8x32xf32>
    %83 = vector.extract_strided_slice %7 {offsets = [32, 0], sizes = [8, 128], strides = [1, 1]} : vector<64x128xf32> to vector<8x128xf32>
    %cst_20 = arith.constant dense<0.000000e+00> : vector<8x128xf32>
    %84 = tpu.matmul %82, %8, %cst_20 {dimension_numbers = #tpu.dot_dimension_numbers<[1], [0], [0], [1], [0, 0, 1, 1], [], []>} : vector<8x32xf32>, vector<32x128xf32>, vector<8x128xf32> -> vector<8x128xf32>
    %85 = arith.addf %83, %84 : vector<8x128xf32>
    %86 = arith.negf %85 : vector<8x128xf32>
    %87 = math.exp %86 : vector<8x128xf32>
    %cst_21 = arith.constant 1.000000e+00 : f32
    %88 = vector.broadcast %cst_21 : f32 to vector<8x128xf32>
    %89 = arith.addf %88, %87 : vector<8x128xf32>
    %90 = arith.divf %88, %89 : vector<8x128xf32>
    %91 = vector.extract_strided_slice %85 {offsets = [0, 64], sizes = [8, 32], strides = [1, 1]} : vector<8x128xf32> to vector<8x32xf32>
    %92 = math.tanh %91 : vector<8x32xf32>
    %93 = vector.extract_strided_slice %90 {offsets = [0, 32], sizes = [8, 32], strides = [1, 1]} : vector<8x128xf32> to vector<8x32xf32>
    %94 = arith.mulf %93, %79 : vector<8x32xf32>
    %95 = vector.extract_strided_slice %90 {offsets = [0, 0], sizes = [8, 32], strides = [1, 1]} : vector<8x128xf32> to vector<8x32xf32>
    %96 = arith.mulf %95, %92 : vector<8x32xf32>
    %97 = arith.addf %94, %96 : vector<8x32xf32>
    %98 = vector.extract_strided_slice %90 {offsets = [0, 96], sizes = [8, 32], strides = [1, 1]} : vector<8x128xf32> to vector<8x32xf32>
    %99 = math.tanh %97 : vector<8x32xf32>
    %100 = arith.mulf %98, %99 : vector<8x32xf32>
    %101 = vector.extract_strided_slice %7 {offsets = [40, 0], sizes = [8, 128], strides = [1, 1]} : vector<64x128xf32> to vector<8x128xf32>
    %cst_22 = arith.constant dense<0.000000e+00> : vector<8x128xf32>
    %102 = tpu.matmul %100, %8, %cst_22 {dimension_numbers = #tpu.dot_dimension_numbers<[1], [0], [0], [1], [0, 0, 1, 1], [], []>} : vector<8x32xf32>, vector<32x128xf32>, vector<8x128xf32> -> vector<8x128xf32>
    %103 = arith.addf %101, %102 : vector<8x128xf32>
    %104 = arith.negf %103 : vector<8x128xf32>
    %105 = math.exp %104 : vector<8x128xf32>
    %cst_23 = arith.constant 1.000000e+00 : f32
    %106 = vector.broadcast %cst_23 : f32 to vector<8x128xf32>
    %107 = arith.addf %106, %105 : vector<8x128xf32>
    %108 = arith.divf %106, %107 : vector<8x128xf32>
    %109 = vector.extract_strided_slice %103 {offsets = [0, 64], sizes = [8, 32], strides = [1, 1]} : vector<8x128xf32> to vector<8x32xf32>
    %110 = math.tanh %109 : vector<8x32xf32>
    %111 = vector.extract_strided_slice %108 {offsets = [0, 32], sizes = [8, 32], strides = [1, 1]} : vector<8x128xf32> to vector<8x32xf32>
    %112 = arith.mulf %111, %97 : vector<8x32xf32>
    %113 = vector.extract_strided_slice %108 {offsets = [0, 0], sizes = [8, 32], strides = [1, 1]} : vector<8x128xf32> to vector<8x32xf32>
    %114 = arith.mulf %113, %110 : vector<8x32xf32>
    %115 = arith.addf %112, %114 : vector<8x32xf32>
    %116 = vector.extract_strided_slice %108 {offsets = [0, 96], sizes = [8, 32], strides = [1, 1]} : vector<8x128xf32> to vector<8x32xf32>
    %117 = math.tanh %115 : vector<8x32xf32>
    %118 = arith.mulf %116, %117 : vector<8x32xf32>
    %119 = vector.extract_strided_slice %7 {offsets = [48, 0], sizes = [8, 128], strides = [1, 1]} : vector<64x128xf32> to vector<8x128xf32>
    %cst_24 = arith.constant dense<0.000000e+00> : vector<8x128xf32>
    %120 = tpu.matmul %118, %8, %cst_24 {dimension_numbers = #tpu.dot_dimension_numbers<[1], [0], [0], [1], [0, 0, 1, 1], [], []>} : vector<8x32xf32>, vector<32x128xf32>, vector<8x128xf32> -> vector<8x128xf32>
    %121 = arith.addf %119, %120 : vector<8x128xf32>
    %122 = arith.negf %121 : vector<8x128xf32>
    %123 = math.exp %122 : vector<8x128xf32>
    %cst_25 = arith.constant 1.000000e+00 : f32
    %124 = vector.broadcast %cst_25 : f32 to vector<8x128xf32>
    %125 = arith.addf %124, %123 : vector<8x128xf32>
    %126 = arith.divf %124, %125 : vector<8x128xf32>
    %127 = vector.extract_strided_slice %121 {offsets = [0, 64], sizes = [8, 32], strides = [1, 1]} : vector<8x128xf32> to vector<8x32xf32>
    %128 = math.tanh %127 : vector<8x32xf32>
    %129 = vector.extract_strided_slice %126 {offsets = [0, 32], sizes = [8, 32], strides = [1, 1]} : vector<8x128xf32> to vector<8x32xf32>
    %130 = arith.mulf %129, %115 : vector<8x32xf32>
    %131 = vector.extract_strided_slice %126 {offsets = [0, 0], sizes = [8, 32], strides = [1, 1]} : vector<8x128xf32> to vector<8x32xf32>
    %132 = arith.mulf %131, %128 : vector<8x32xf32>
    %133 = arith.addf %130, %132 : vector<8x32xf32>
    %134 = vector.extract_strided_slice %126 {offsets = [0, 96], sizes = [8, 32], strides = [1, 1]} : vector<8x128xf32> to vector<8x32xf32>
    %135 = math.tanh %133 : vector<8x32xf32>
    %136 = arith.mulf %134, %135 : vector<8x32xf32>
    %137 = vector.extract_strided_slice %7 {offsets = [56, 0], sizes = [8, 128], strides = [1, 1]} : vector<64x128xf32> to vector<8x128xf32>
    %cst_26 = arith.constant dense<0.000000e+00> : vector<8x128xf32>
    %138 = tpu.matmul %136, %8, %cst_26 {dimension_numbers = #tpu.dot_dimension_numbers<[1], [0], [0], [1], [0, 0, 1, 1], [], []>} : vector<8x32xf32>, vector<32x128xf32>, vector<8x128xf32> -> vector<8x128xf32>
    %139 = arith.addf %137, %138 : vector<8x128xf32>
    %140 = arith.negf %139 : vector<8x128xf32>
    %141 = math.exp %140 : vector<8x128xf32>
    %cst_27 = arith.constant 1.000000e+00 : f32
    %142 = vector.broadcast %cst_27 : f32 to vector<8x128xf32>
    %143 = arith.addf %142, %141 : vector<8x128xf32>
    %144 = arith.divf %142, %143 : vector<8x128xf32>
    %145 = vector.extract_strided_slice %139 {offsets = [0, 64], sizes = [8, 32], strides = [1, 1]} : vector<8x128xf32> to vector<8x32xf32>
    %146 = math.tanh %145 : vector<8x32xf32>
    %147 = vector.extract_strided_slice %144 {offsets = [0, 32], sizes = [8, 32], strides = [1, 1]} : vector<8x128xf32> to vector<8x32xf32>
    %148 = arith.mulf %147, %133 : vector<8x32xf32>
    %149 = vector.extract_strided_slice %144 {offsets = [0, 0], sizes = [8, 32], strides = [1, 1]} : vector<8x128xf32> to vector<8x32xf32>
    %150 = arith.mulf %149, %146 : vector<8x32xf32>
    %151 = arith.addf %148, %150 : vector<8x32xf32>
    %152 = vector.extract_strided_slice %144 {offsets = [0, 96], sizes = [8, 32], strides = [1, 1]} : vector<8x128xf32> to vector<8x32xf32>
    %153 = math.tanh %151 : vector<8x32xf32>
    %154 = arith.mulf %152, %153 : vector<8x32xf32>
    %c0_28 = arith.constant 0 : index
    %c0_29 = arith.constant 0 : index
    %155 = vector.load %arg4[%c0_28, %c0_29] : memref<32x128xf32, #tpu.memory_space<vmem>>, vector<32x128xf32>
    %cst_30 = arith.constant dense<0.000000e+00> : vector<8x128xf32>
    %156 = tpu.matmul %154, %155, %cst_30 {dimension_numbers = #tpu.dot_dimension_numbers<[1], [0], [0], [1], [0, 0, 1, 1], [], []>} : vector<8x32xf32>, vector<32x128xf32>, vector<8x128xf32> -> vector<8x128xf32>
    %c0_31 = arith.constant 0 : index
    %c0_32 = arith.constant 0 : index
    %157 = vector.load %arg5[%c0_31, %c0_32] : memref<1x128xf32, #tpu.memory_space<vmem>>, vector<1x128xf32>
    %158 = vector.broadcast %157 : vector<1x128xf32> to vector<8x128xf32>
    %159 = arith.addf %156, %158 : vector<8x128xf32>
    %160 = arith.negf %159 : vector<8x128xf32>
    %161 = math.exp %160 : vector<8x128xf32>
    %cst_33 = arith.constant 1.000000e+00 : f32
    %162 = vector.broadcast %cst_33 : f32 to vector<8x128xf32>
    %163 = arith.addf %162, %161 : vector<8x128xf32>
    %164 = arith.divf %162, %163 : vector<8x128xf32>
    %165 = vector.extract_strided_slice %159 {offsets = [0, 0], sizes = [8, 32], strides = [1, 1]} : vector<8x128xf32> to vector<8x32xf32>
    %166 = math.tanh %165 : vector<8x32xf32>
    %167 = vector.extract_strided_slice %164 {offsets = [0, 32], sizes = [8, 32], strides = [1, 1]} : vector<8x128xf32> to vector<8x32xf32>
    %168 = vector.extract_strided_slice %164 {offsets = [0, 64], sizes = [8, 32], strides = [1, 1]} : vector<8x128xf32> to vector<8x32xf32>
    %169 = vector.extract_strided_slice %164 {offsets = [0, 96], sizes = [8, 32], strides = [1, 1]} : vector<8x128xf32> to vector<8x32xf32>
    %c0_34 = arith.constant 0 : index
    %c0_35 = arith.constant 0 : index
    %170 = vector.load %arg6[%c0_34, %c0_35] : memref<32x32xf32, #tpu.memory_space<vmem>>, vector<32x32xf32>
    %cst_36 = arith.constant dense<0.000000e+00> : vector<8x32xf32>
    %171 = tpu.matmul %166, %170, %cst_36 {dimension_numbers = #tpu.dot_dimension_numbers<[1], [0], [0], [1], [0, 0, 1, 1], [], []>} : vector<8x32xf32>, vector<32x32xf32>, vector<8x32xf32> -> vector<8x32xf32>
    %c0_37 = arith.constant 0 : index
    %c0_38 = arith.constant 0 : index
    %172 = vector.load %arg7[%c0_37, %c0_38] : memref<1x32xf32, #tpu.memory_space<vmem>>, vector<1x32xf32>
    %173 = vector.broadcast %172 : vector<1x32xf32> to vector<8x32xf32>
    %174 = arith.addf %171, %173 : vector<8x32xf32>
    %175 = arith.negf %174 : vector<8x32xf32>
    %176 = math.exp %175 : vector<8x32xf32>
    %cst_39 = arith.constant 1.000000e+00 : f32
    %177 = vector.broadcast %cst_39 : f32 to vector<8x32xf32>
    %178 = arith.addf %177, %176 : vector<8x32xf32>
    %179 = arith.divf %177, %178 : vector<8x32xf32>
    %180 = arith.mulf %167, %154 : vector<8x32xf32>
    %181 = arith.mulf %168, %179 : vector<8x32xf32>
    %182 = arith.addf %180, %181 : vector<8x32xf32>
    %c0_40 = arith.constant 0 : index
    %c0_41 = arith.constant 0 : index
    %183 = vector.load %arg8[%c0_40, %c0_41] : memref<1x32xf32, #tpu.memory_space<vmem>>, vector<1x32xf32>
    %184 = vector.broadcast %183 : vector<1x32xf32> to vector<8x32xf32>
    %185 = arith.mulf %182, %184 : vector<8x32xf32>
    %cst_42 = arith.constant dense<0.000000e+00> : vector<8xf32>
    %186 = vector.multi_reduction <add>, %185, %cst_42 [1] : vector<8x32xf32> to vector<8xf32>
    %187 = vector.shape_cast %186 : vector<8xf32> to vector<8x1xf32>
    %c0_43 = arith.constant 0 : index
    %c0_44 = arith.constant 0 : index
    %188 = vector.load %arg9[%c0_43, %c0_44] : memref<1x1xf32, #tpu.memory_space<vmem>>, vector<1x1xf32>
    %189 = vector.broadcast %188 : vector<1x1xf32> to vector<8x1xf32>
    %190 = arith.addf %187, %189 : vector<8x1xf32>
    %c0_45 = arith.constant 0 : index
    %c0_46 = arith.constant 0 : index
    %191 = vector.load %arg10[%c0_45, %c0_46] : memref<8x256xf32, #tpu.memory_space<vmem>>, vector<8x32xf32>
    tpu.vector_store %arg10[%c0_45, %c0_46], %166 {strides = array<i32>} : memref<8x256xf32, #tpu.memory_space<vmem>>, vector<8x32xf32>,
    %c0_47 = arith.constant 0 : index
    %c32 = arith.constant 32 : index
    %192 = vector.load %arg10[%c0_47, %c32] : memref<8x256xf32, #tpu.memory_space<vmem>>, vector<8x32xf32>
    tpu.vector_store %arg10[%c0_47, %c32], %179 {strides = array<i32>} : memref<8x256xf32, #tpu.memory_space<vmem>>, vector<8x32xf32>,
    %c0_48 = arith.constant 0 : index
    %c64 = arith.constant 64 : index
    %193 = vector.load %arg10[%c0_48, %c64] : memref<8x256xf32, #tpu.memory_space<vmem>>, vector<8x32xf32>
    tpu.vector_store %arg10[%c0_48, %c64], %167 {strides = array<i32>} : memref<8x256xf32, #tpu.memory_space<vmem>>, vector<8x32xf32>,
    %c0_49 = arith.constant 0 : index
    %c96 = arith.constant 96 : index
    %194 = vector.load %arg10[%c0_49, %c96] : memref<8x256xf32, #tpu.memory_space<vmem>>, vector<8x32xf32>
    tpu.vector_store %arg10[%c0_49, %c96], %168 {strides = array<i32>} : memref<8x256xf32, #tpu.memory_space<vmem>>, vector<8x32xf32>,
    %c0_50 = arith.constant 0 : index
    %c128 = arith.constant 128 : index
    %195 = vector.load %arg10[%c0_50, %c128] : memref<8x256xf32, #tpu.memory_space<vmem>>, vector<8x32xf32>
    tpu.vector_store %arg10[%c0_50, %c128], %169 {strides = array<i32>} : memref<8x256xf32, #tpu.memory_space<vmem>>, vector<8x32xf32>,
    %c0_51 = arith.constant 0 : index
    %c160 = arith.constant 160 : index
    %196 = vector.load %arg10[%c0_51, %c160] : memref<8x256xf32, #tpu.memory_space<vmem>>, vector<8x1xf32>
    tpu.vector_store %arg10[%c0_51, %c160], %190 {strides = array<i32>} : memref<8x256xf32, #tpu.memory_space<vmem>>, vector<8x1xf32>,
    return
  }
}

</mosaic_0001>

<bundles_post_ra>
// kernel: tpu_custom_call.1
= control target key start
LH: loop header
LB: loop body
LE: loop exit
PB: predicated region body
PF: predicated region fallthrough
CT: control target
= control target key end

     0   :  { %s1983_s0 = inlined_call_operand.vmem [shape: f32[64,16], index: 0, kind: input, shape index: {}]   ;;  %s1984_s1 = inlined_call_operand.hbm [shape: f32[16,128], index: 1, kind: input, shape index: {}]   ;;  %s1985_s2 = inlined_call_operand.vmem [shape: f32[32,128], index: 2, kind: input, shape index: {}]   ;;  %s1986_s3 = inlined_call_operand.vmem [shape: f32[1,128], index: 3, kind: input, shape index: {}]   ;;  %s1987_s4 = inlined_call_operand.vmem [shape: f32[32,128], index: 4, kind: input, shape index: {}]   ;;  %s1988_s5 = inlined_call_operand.vmem [shape: f32[1,128], index: 5, kind: input, shape index: {}]   ;;  %s1989_s6 = inlined_call_operand.vmem [shape: f32[32,32], index: 6, kind: input, shape index: {}]   ;;  %s1990_s7 = inlined_call_operand.vmem [shape: f32[1,32], index: 7, kind: input, shape index: {}]   ;;  %s1991_s8 = inlined_call_operand.vmem [shape: f32[1,32], index: 8, kind: input, shape index: {}]   ;;  %s1992_s9 = inlined_call_operand.<no memory space> [shape: f32[1,1], index: 9, kind: input, shape index: {}]   ;;  %s1993_s10 = inlined_call_operand.hbm [shape: f32[8,256], index: 10, kind: output, shape index: {}]  }
   0x1   :  { %v15_v0 = vstv %s1992_s9 }
   0x2   :  { %16 = vst [vmem:[#allocation2] sm:$0x1] %v15_v0 }
   0x3   :  { %17 = vsyncpa [#allocation4], 0 }
   0x4   :  { %18 = vsyncpa [#allocation5], 0  ;;  %s1676_s15 = smov [#allocation3]   ;;  %s1628_s19 = scalar_lea.hbm %s1984_s1, 256 }
   0x5   :  { %s26_s16 = sshll.u32 %s1676_s15, 4  ;;  %p1629_p0 = scmp.ne.s32.totalorder %s1984_s1, %s1628_s19  ;;  %s27_s16 = int_to_ptr.vmem [resolvable:$true] %s26_s16 }
   0x6   :  { %p1632_p1 = scmp.lt.u32.totalorder %s1628_s19, %s1984_s1 }
   0x8   :  { %p1634_p2 = pnand %p1632_p1, %p1629_p0 }
   0xa   :  { %1637 = shalt.err (!%p1634_p2)
}
   0xb   :  { %s1638_s9 = scalar_lea.vmem %s27_s16, 256  ;;  %p1643_p4 = scmp.lt.s32.totalorder %s27_s16, %s27_s16 }
   0xc   :  { %p1639_p3 = scmp.ne.s32.totalorder %s27_s16, %s1638_s9  ;;  %p1644_p5 = scmp.lt.s32.totalorder %s1638_s9, %s1638_s9 }
   0xe   :  { %p1645_p6 = por %p1644_p5, %p1643_p4 }
  0x10   :  { %p1646_p7 = pnand %p1645_p6, %p1639_p3 }
  0x12   :  { %1649 = shalt.err (!%p1646_p7)
}
  0x13   :  { %s1677_s24 = smov 128   ;;  %s1678_s25 = smov 8  }
  0x14   :  { %32 = dma.hbm_to_vmem [thread:$0]  %s1984_s1, 256, %s27_s16, [#allocation4], %s1677_s24, %s1677_s24, %s1678_s25  }
  0x15   :  { %1672 = dma.done.wait [#allocation4], 256  }
  0x16   :  { %1673 = vsyncadd [#allocation4], 4294967040  ;;  %v1679_v1 = vmov 0.0|0.0   ;;  %vm1680_vm0 = vmmov 0   ;;  %v1681_v2 = vmov 0.0   ;;  %vm71_vm1 = vcmask 130048  }
  0x17   :  { %1484 = vmatprep.subr.bf16.mxu1 %v1679_v1  ;;  %1378 = vmatprep.mubr.msk.f32.mxu1 %vm1680_vm0, %v1681_v2  ;;  %52 = vst [vmem:[#allocation6] sm:$0xff] %v1681_v2  ;;  %53 = vst [vmem:[#allocation6 + $0x8] sm:$0xff] %v1681_v2  ;;  %v62_v3 = vld [vmem:[#allocation3] sm:$0xff]  ;;  %v63_v4 = vld [vmem:[#allocation3 + $0x8] sm:$0xff]  ;;  %s1682_s20 = smov 64   ;;  %vm205_vm2 = vcmask 261120  }
  0x18   :  { %v201_v5 = vld [vmem:[%s1985_s2] sm:$0xff]  ;;  %v1480_v6 = vpack.c.bf16 %v63_v4, %v62_v3  ;;  %v202_v7 = vld [vmem:[%s1985_s2 + $0x8] sm:$0xff]  ;;  %v203_v10 = vld [vmem:[%s1985_s2 + $0x10] sm:$0xff]  ;;  %vm1230_vm3 = vcmask 523520   ;;  %vm1236_vm4 = vcmask 785920   ;;  %vm1238_vm5 = vcmask 1048320  }
  0x19   :  { %v54_v8 = vld [vmem:[%s1983_s0] sm:$0xff]  ;;  %v1770_v9 = vpack.c.bf16 %v202_v7, %v201_v5  ;;  %v204_v11 = vld [vmem:[%s1985_s2 + $0x18] sm:$0xff]  ;;  %v55_v12 = vld [vmem:[%s1983_s0 + $0x8] sm:$0xff]  ;;  %vm1245_vm6 = vcmask 269568  }
  0x1a   :  { %1358 = vmatprep.mubr.msk.f32.mxu0 %vm71_vm1, %v54_v8  ;;  %1481 = vmatprep.subr.bf16.mxu0 %v1480_v6  ;;  %v1783_v13 = vpack.c.bf16 %v204_v11, %v203_v10  ;;  %v1804_v14 = vld [vmem:[%s1986_s3] ss:$0 sm:$0xff]  ;;  %s1683_s3 = smov 32   ;;  %v56_v49 = vld [vmem:[%s1983_s0 + $0x10] sm:$0xff]  ;;  %v57_v50 = vld [vmem:[%s1983_s0 + $0x18] sm:$0xff] }
  0x1b   :  { %1486 = vmatpush3.bf16.msra.mxu1 %v1770_v9  ;;  %1483 = vmatpush3.bf16.msra.mxu0 %v1480_v6  ;;  %v58_v51 = vld [vmem:[%s1983_s0 + $0x20] sm:$0xff]  ;;  %v59_v52 = vld [vmem:[%s1983_s0 + $0x28] sm:$0xff]  ;;  %v60_v53 = vld [vmem:[%s1983_s0 + $0x30] sm:$0xff] }
  0x1c   :  { %1487 = vmatprep.subr.bf16.mxu1 %v1679_v1  ;;  %1496 = vmatprep.subr.bf16.mxu0 %v1679_v1  ;;  %v61_v54 = vld [vmem:[%s1983_s0 + $0x38] sm:$0xff] }
  0x1e   :  { %1359 = vmatmul.mubr.msk.f32.vlgmr.msra.gmra.mrb[0].mxu0 %vm71_vm1, %v55_v12 }
  0x1f   :  { %1489 = vmatpush3.bf16.msra.mxu1 %v1783_v13  ;;  %1498 = vmatpush3.bf16.msra.mxu0 %v1770_v9 }
  0x20   :  { %1490 = vmatprep.subr.bf16.mxu1 %v1679_v1  ;;  %1499 = vmatprep.subr.bf16.mxu0 %v1679_v1 }
  0x21   :  { %1361 = vmatprep.mubr.msk.f32.mxu0 %vm71_vm1, %v56_v49 }
  0x22   :  { %1379 = vmatmul.mubr.f32.vlgmr.msra.gmra.mrb[0].mxu1 %v1681_v2  ;;  %1362 = vmatmul.mubr.msk.f32.gmra.mrb[2].mxu0 %vm71_vm1, %v57_v50 }
  0x23   :  { %1492 = vmatpush3.bf16.msra.mxu1 %v1770_v9  ;;  %1389 = vmatprep.mubr.msk.f32.mxu1 %vm1680_vm0, %v1681_v2 }
  0x24   :  { %1493 = vmatprep.subr.bf16.mxu1 %v1679_v1  ;;  %1501 = vmatpush3.bf16.msra.mxu0 %v1783_v13 }
  0x25   :  { %1508 = vmatprep.subr.bf16.mxu0 %v1679_v1  ;;  %1364 = vmatprep.mubr.msk.f32.mxu0 %vm71_vm1, %v58_v51 }
  0x26   :  { %1365 = vmatmul.mubr.msk.f32.gmra.mrb[4].mxu0 %vm71_vm1, %v59_v52 }
  0x27   :  { %1495 = vmatpush3.bf16.msra.mxu1 %v1783_v13  ;;  %1367 = vmatprep.mubr.msk.f32.mxu0 %vm71_vm1, %v60_v53 }
  0x28   :  { %1502 = vmatprep.subr.bf16.mxu1 %v1679_v1 }
  0x2a   :  { %1368 = vmatmul.mubr.msk.f32.gmra.mrb[6].mxu0 %vm71_vm1, %v61_v54 }
  0x2b   :  { %1400 = vmatprep.mubr.msk.f32.mxu0 %vm1680_vm0, %v1681_v2 }
  0xf1   :  { %v1360_v15 = vpop.f32.mrb[0].mxu0 }
  0xf2   :  { %v162_v16 = vpop.f32.mrb[1].mxu0  ;;  %v168_v35 = vadd.f32 %v1360_v15, %v1804_v14 }
  0xf3   :  { %v163_v17 = vadd.f32 %v1804_v14, %v162_v16 }
  0xf5   :  { %v275_v18 = vpop.f32.mrb[0].mxu1  ;;  %v1363_v58 = vpop.f32.mrb[2].mxu0 }
  0xf6   :  { %v279_v19 = vadd.f32 %v275_v18, %v163_v17  ;;  %v1380_v20 = vpop.f32.mrb[1].mxu1  ;;  %v172_v59 = vpop.f32.mrb[3].mxu0 }
  0xf7   :  { %v173_v3 = vadd.f32 %v1804_v14, %v172_v59 }
  0xf8   :  { %1554 = vtanh.f32 %v279_v19  ;;  %v1271_v22 = vmul.f32 -1.442695, %v279_v19 }
  0xf9   :  { %v1849_v60 = vpop.f32.mrb[4].mxu0 }
  0xfa   :  { %1556 = vpow2.f32 %v1271_v22  ;;  %v1851_v61 = vpop.f32.mrb[5].mxu0 }
  0xfd   :  { %v1853_v62 = vpop.f32.mrb[6].mxu0 }
  0xfe   :  { %v1855_v63 = vpop.f32.mrb[7].mxu0 }
 0x102   :  { %v1555_v21 = vpop.eup %1554 }
 0x103   :  { %289 = vrot.lane.b32.xlu0 %v1555_v21, %s1682_s20 }
 0x104   :  { %v1557_v23 = vpop.eup %1556 }
 0x105   :  { %v283_v24 = vadd.f32 1.0, %v1557_v23 }
 0x107   :  { %1558 = vrcp.f32 %v283_v24  ;;  %v178_v24 = vadd.f32 %v1363_v58, %v1804_v14 }
 0x111   :  { %v1559_v25 = vpop.eup %1558 }
 0x112   :  { %v287_v28 = vmul.f32 0.0, %v1559_v25 }
 0x175   :  { %v290_v26 = vpop.permute.xlu0 %289 }
 0x176   :  { %v292_v27 = vmul.f32 %v1559_v25, %v290_v26 }
 0x178   :  { %294 = vrot.lane.b32.xlu0 %v292_v27, %s1683_s3 }
 0x1ea   :  { %v295_v29 = vpop.permute.xlu0 %294 }
 0x1eb   :  { %v297_v30 = vadd.f32 %v295_v29, %v287_v28 }
 0x1ed   :  { %1560 = vtanh.f32 %v297_v30 }
 0x1f7   :  { %v1561_v31 = vpop.eup %1560 }
 0x1f8   :  { %300 = vrot.lane.b32.xlu1 %v1561_v31, %s1682_s20 }
 0x26a   :  { %v301_v32 = vpop.permute.xlu1 %300 }
 0x26b   :  { %v303_v33 = vmul.f32 %v1559_v25, %v301_v32 }
 0x26d   :  { %305 = vrot.lane.b32.xlu1 %v303_v33, %s1683_s3 }
 0x2df   :  { %v306_v34 = vpop.permute.xlu1 %305 }
 0x2e0   :  { %1390 = vmatmul.mubr.msk.f32.vlgmr.msra.gmra.mrb[2].mxu1 %vm205_vm2, %v306_v34 }
 0x2e1   :  { %1504 = vmatpush3.bf16.msra.mxu1 %v1770_v9  ;;  %1411 = vmatprep.mubr.msk.f32.mxu1 %vm1680_vm0, %v1681_v2 }
 0x2e2   :  { %1505 = vmatprep.subr.bf16.mxu1 %v1679_v1 }
 0x2e5   :  { %1507 = vmatpush3.bf16.msra.mxu1 %v1783_v13 }
 0x2e6   :  { %1514 = vmatprep.subr.bf16.mxu1 %v1679_v1 }
 0x3b3   :  { %v375_v36 = vpop.f32.mrb[2].mxu1 }
 0x3b4   :  { %v379_v37 = vadd.f32 %v375_v36, %v168_v35  ;;  %v1391_v38 = vpop.f32.mrb[3].mxu1 }
 0x3b6   :  { %1562 = vtanh.f32 %v379_v37  ;;  %v1273_v40 = vmul.f32 -1.442695, %v379_v37 }
 0x3b8   :  { %1564 = vpow2.f32 %v1273_v40 }
 0x3c0   :  { %v1563_v39 = vpop.eup %1562 }
 0x3c1   :  { %389 = vrot.lane.b32.xlu0 %v1563_v39, %s1682_s20 }
 0x3c2   :  { %v1565_v41 = vpop.eup %1564 }
 0x3c3   :  { %v383_v42 = vadd.f32 1.0, %v1565_v41 }
 0x3c5   :  { %1566 = vrcp.f32 %v383_v42  ;;  %v183_v42 = vadd.f32 %v1804_v14, %v1851_v61  ;;  %v188_v61 = vadd.f32 %v1849_v60, %v1804_v14 }
 0x3cf   :  { %v1567_v43 = vpop.eup %1566 }
 0x3d0   :  { %v387_v46 = vmul.f32 %v1567_v43, %v297_v30 }
 0x433   :  { %v390_v44 = vpop.permute.xlu0 %389 }
 0x434   :  { %v392_v45 = vmul.f32 %v1567_v43, %v390_v44 }
 0x436   :  { %394 = vrot.lane.b32.xlu1 %v392_v45, %s1683_s3 }
 0x4a8   :  { %v395_v47 = vpop.permute.xlu1 %394 }
 0x4a9   :  { %v397_v48 = vadd.f32 %v395_v47, %v387_v46 }
 0x4ab   :  { %1568 = vtanh.f32 %v397_v48 }
 0x4b5   :  { %v1569_v55 = vpop.eup %1568 }
 0x4b6   :  { %400 = vrot.lane.b32.xlu0 %v1569_v55, %s1682_s20 }
 0x528   :  { %v401_v56 = vpop.permute.xlu0 %400 }
 0x529   :  { %v403_v57 = vmul.f32 %v1567_v43, %v401_v56 }
 0x52b   :  { %405 = vrot.lane.b32.xlu1 %v403_v57, %s1683_s3 }
 0x59d   :  { %v406_v0 = vpop.permute.xlu1 %405 }
 0x59e   :  { %1401 = vmatmul.mubr.msk.f32.vlgmr.msra.gmra.mrb[8].mxu0 %vm205_vm2, %v406_v0 }
 0x59f   :  { %1510 = vmatpush3.bf16.msra.mxu0 %v1770_v9  ;;  %1422 = vmatprep.mubr.msk.f32.mxu0 %vm1680_vm0, %v1681_v2 }
 0x5a0   :  { %1511 = vmatprep.subr.bf16.mxu0 %v1679_v1 }
 0x5a3   :  { %1513 = vmatpush3.bf16.msra.mxu0 %v1783_v13 }
 0x5a4   :  { %1520 = vmatprep.subr.bf16.mxu0 %v1679_v1 }
 0x671   :  { %v475_v4 = vpop.f32.mrb[8].mxu0 }
 0x672   :  { %v479_v5 = vadd.f32 %v475_v4, %v173_v3  ;;  %v1402_v6 = vpop.f32.mrb[9].mxu0 }
 0x674   :  { %1570 = vtanh.f32 %v479_v5  ;;  %v1275_v8 = vmul.f32 -1.442695, %v479_v5 }
 0x676   :  { %1572 = vpow2.f32 %v1275_v8 }
 0x67e   :  { %v1571_v7 = vpop.eup %1570 }
 0x67f   :  { %489 = vrot.lane.b32.xlu0 %v1571_v7, %s1682_s20 }
 0x680   :  { %v1573_v10 = vpop.eup %1572 }
 0x681   :  { %v483_v11 = vadd.f32 1.0, %v1573_v10 }
 0x683   :  { %1574 = vrcp.f32 %v483_v11 }
 0x68d   :  { %v1575_v12 = vpop.eup %1574 }
 0x68e   :  { %v487_v17 = vmul.f32 %v1575_v12, %v397_v48 }
 0x6f1   :  { %v490_v15 = vpop.permute.xlu0 %489 }
 0x6f2   :  { %v492_v16 = vmul.f32 %v1575_v12, %v490_v15 }
 0x6f4   :  { %494 = vrot.lane.b32.xlu1 %v492_v16, %s1683_s3 }
 0x766   :  { %v495_v18 = vpop.permute.xlu1 %494 }
 0x767   :  { %v497_v19 = vadd.f32 %v495_v18, %v487_v17 }
 0x769   :  { %1576 = vtanh.f32 %v497_v19 }
 0x773   :  { %v1577_v20 = vpop.eup %1576 }
 0x774   :  { %500 = vrot.lane.b32.xlu0 %v1577_v20, %s1682_s20 }
 0x7e6   :  { %v501_v21 = vpop.permute.xlu0 %500 }
 0x7e7   :  { %v503_v22 = vmul.f32 %v1575_v12, %v501_v21 }
 0x7e9   :  { %505 = vrot.lane.b32.xlu1 %v503_v22, %s1683_s3 }
 0x85b   :  { %v506_v23 = vpop.permute.xlu1 %505 }
 0x85c   :  { %1412 = vmatmul.mubr.msk.f32.vlgmr.msra.gmra.mrb[4].mxu1 %vm205_vm2, %v506_v23 }
 0x85d   :  { %1516 = vmatpush3.bf16.msra.mxu1 %v1770_v9  ;;  %1433 = vmatprep.mubr.msk.f32.mxu1 %vm1680_vm0, %v1681_v2 }
 0x85e   :  { %1517 = vmatprep.subr.bf16.mxu1 %v1679_v1 }
 0x861   :  { %1519 = vmatpush3.bf16.msra.mxu1 %v1783_v13 }
 0x862   :  { %1526 = vmatprep.subr.bf16.mxu1 %v1679_v1 }
 0x92f   :  { %v575_v25 = vpop.f32.mrb[4].mxu1 }
 0x930   :  { %v579_v26 = vadd.f32 %v575_v25, %v178_v24  ;;  %v1413_v27 = vpop.f32.mrb[5].mxu1 }
 0x932   :  { %1578 = vtanh.f32 %v579_v26  ;;  %v1277_v29 = vmul.f32 -1.442695, %v579_v26 }
 0x934   :  { %1580 = vpow2.f32 %v1277_v29 }
 0x93c   :  { %v1579_v28 = vpop.eup %1578 }
 0x93d   :  { %589 = vrot.lane.b32.xlu0 %v1579_v28, %s1682_s20 }
 0x93e   :  { %v1581_v30 = vpop.eup %1580 }
 0x93f   :  { %v583_v31 = vadd.f32 1.0, %v1581_v30 }
 0x941   :  { %1582 = vrcp.f32 %v583_v31 }
 0x94b   :  { %v1583_v32 = vpop.eup %1582 }
 0x94c   :  { %v587_v35 = vmul.f32 %v1583_v32, %v497_v19  ;;  %v193_v19 = vadd.f32 %v1804_v14, %v1855_v63 }
 0x9af   :  { %v590_v33 = vpop.permute.xlu0 %589 }
 0x9b0   :  { %v592_v34 = vmul.f32 %v1583_v32, %v590_v33 }
 0x9b2   :  { %594 = vrot.lane.b32.xlu1 %v592_v34, %s1683_s3 }
 0xa24   :  { %v595_v36 = vpop.permute.xlu1 %594 }
 0xa25   :  { %v597_v37 = vadd.f32 %v595_v36, %v587_v35  ;;  %v198_v36 = vadd.f32 %v1853_v62, %v1804_v14  ;;  %v1004_v62 = vld [vmem:[%s1987_s4] sm:$0xff] }
 0xa27   :  { %1584 = vtanh.f32 %v597_v37 }
 0xa31   :  { %v1585_v38 = vpop.eup %1584 }
 0xa32   :  { %600 = vrot.lane.b32.xlu0 %v1585_v38, %s1682_s20 }
 0xaa4   :  { %v601_v39 = vpop.permute.xlu0 %600 }
 0xaa5   :  { %v603_v40 = vmul.f32 %v1583_v32, %v601_v39 }
 0xaa7   :  { %605 = vrot.lane.b32.xlu1 %v603_v40, %s1683_s3 }
 0xb19   :  { %v606_v41 = vpop.permute.xlu1 %605 }
 0xb1a   :  { %1423 = vmatmul.mubr.msk.f32.vlgmr.msra.gmra.mrb[10].mxu0 %vm205_vm2, %v606_v41 }
 0xb1b   :  { %1522 = vmatpush3.bf16.msra.mxu0 %v1770_v9  ;;  %1444 = vmatprep.mubr.msk.f32.mxu0 %vm1680_vm0, %v1681_v2 }
 0xb1c   :  { %1523 = vmatprep.subr.bf16.mxu0 %v1679_v1 }
 0xb1f   :  { %1525 = vmatpush3.bf16.msra.mxu0 %v1783_v13 }
 0xb20   :  { %1532 = vmatprep.subr.bf16.mxu0 %v1679_v1 }
 0xbed   :  { %v675_v43 = vpop.f32.mrb[10].mxu0 }
 0xbee   :  { %v679_v44 = vadd.f32 %v675_v43, %v183_v42  ;;  %v1424_v45 = vpop.f32.mrb[11].mxu0 }
 0xbf0   :  { %1586 = vtanh.f32 %v679_v44  ;;  %v1279_v47 = vmul.f32 -1.442695, %v679_v44 }
 0xbf2   :  { %1588 = vpow2.f32 %v1279_v47 }
 0xbfa   :  { %v1587_v46 = vpop.eup %1586 }
 0xbfb   :  { %689 = vrot.lane.b32.xlu0 %v1587_v46, %s1682_s20 }
 0xbfc   :  { %v1589_v48 = vpop.eup %1588 }
 0xbfd   :  { %v683_v49 = vadd.f32 1.0, %v1589_v48  ;;  %v1005_v48 = vld [vmem:[%s1987_s4 + $0x8] sm:$0xff] }
 0xbff   :  { %1590 = vrcp.f32 %v683_v49  ;;  %v1006_v49 = vld [vmem:[%s1987_s4 + $0x10] sm:$0xff] }
 0xc09   :  { %v1591_v50 = vpop.eup %1590 }
 0xc0a   :  { %v687_v53 = vmul.f32 %v1591_v50, %v597_v37 }
 0xc6d   :  { %v690_v51 = vpop.permute.xlu0 %689 }
 0xc6e   :  { %v692_v52 = vmul.f32 %v1591_v50, %v690_v51  ;;  %v1007_v51 = vld [vmem:[%s1987_s4 + $0x18] sm:$0xff] }
 0xc70   :  { %694 = vrot.lane.b32.xlu1 %v692_v52, %s1683_s3  ;;  %v1536_v52 = vpack.c.bf16 %v1007_v51, %v1006_v49 }
 0xce2   :  { %v695_v54 = vpop.permute.xlu1 %694 }
 0xce3   :  { %v697_v55 = vadd.f32 %v695_v54, %v687_v53 }
 0xce5   :  { %1592 = vtanh.f32 %v697_v55 }
 0xcef   :  { %v1593_v56 = vpop.eup %1592 }
 0xcf0   :  { %700 = vrot.lane.b32.xlu0 %v1593_v56, %s1682_s20 }
 0xd62   :  { %v701_v57 = vpop.permute.xlu0 %700 }
 0xd63   :  { %v703_v58 = vmul.f32 %v1591_v50, %v701_v57  ;;  %v1533_v50 = vpack.c.bf16 %v1005_v48, %v1004_v62  ;;  %v1097_v57 = vld [vmem:[%s1989_s6] sm:$0xff] }
 0xd65   :  { %705 = vrot.lane.b32.xlu1 %v703_v58, %s1683_s3  ;;  %v1098_v58 = vld [vmem:[%s1989_s6 + $0x8] sm:$0xff] }
 0xdd7   :  { %v706_v59 = vpop.permute.xlu1 %705 }
 0xdd8   :  { %1434 = vmatmul.mubr.msk.f32.vlgmr.msra.gmra.mrb[6].mxu1 %vm205_vm2, %v706_v59  ;;  %v1539_v59 = vpack.c.bf16 %v1098_v58, %v1097_v57 }
 0xdd9   :  { %1528 = vmatpush3.bf16.msra.mxu1 %v1770_v9  ;;  %1455 = vmatprep.mubr.msk.f32.mxu1 %vm1680_vm0, %v1681_v2 }
 0xdda   :  { %1529 = vmatprep.subr.bf16.mxu1 %v1679_v1 }
 0xddd   :  { %1531 = vmatpush3.bf16.msra.mxu1 %v1783_v13 }
 0xdde   :  { %1538 = vmatprep.subr.bf16.mxu1 %v1679_v1 }
 0xeab   :  { %v775_v0 = vpop.f32.mrb[6].mxu1 }
 0xeac   :  { %v779_v3 = vadd.f32 %v775_v0, %v188_v61  ;;  %v1435_v4 = vpop.f32.mrb[7].mxu1  ;;  %v1099_v61 = vld [vmem:[%s1989_s6 + $0x10] sm:$0xff]  ;;  %v1100_v0 = vld [vmem:[%s1989_s6 + $0x18] sm:$0xff] }
 0xead   :  { %v1286_v4 = vld [vmem:[%s1988_s5] ss:$0 sm:$0xff] }
 0xeae   :  { %1594 = vtanh.f32 %v779_v3  ;;  %v1281_v9 = vmul.f32 -1.442695, %v779_v3  ;;  %v1542_v3 = vpack.c.bf16 %v1100_v0, %v1099_v61 }
 0xeb0   :  { %1596 = vpow2.f32 %v1281_v9 }
 0xeb8   :  { %v1595_v5 = vpop.eup %1594 }
 0xeb9   :  { %789 = vrot.lane.b32.xlu0 %v1595_v5, %s1682_s20 }
 0xeba   :  { %v1597_v6 = vpop.eup %1596 }
 0xebb   :  { %v783_v7 = vadd.f32 1.0, %v1597_v6 }
 0xebd   :  { %1598 = vrcp.f32 %v783_v7 }
 0xec7   :  { %v1599_v8 = vpop.eup %1598 }
 0xec8   :  { %v787_v11 = vmul.f32 %v1599_v8, %v697_v55 }
 0xf2b   :  { %v790_v10 = vpop.permute.xlu0 %789 }
 0xf2c   :  { %v792_v13 = vmul.f32 %v1599_v8, %v790_v10 }
 0xf2e   :  { %794 = vrot.lane.b32.xlu1 %v792_v13, %s1683_s3 }
 0xfa0   :  { %v795_v12 = vpop.permute.xlu1 %794 }
 0xfa1   :  { %v797_v60 = vadd.f32 %v795_v12, %v787_v11 }
 0xfa3   :  { %1600 = vtanh.f32 %v797_v60 }
 0xfad   :  { %v1601_v15 = vpop.eup %1600 }
 0xfae   :  { %800 = vrot.lane.b32.xlu0 %v1601_v15, %s1682_s20  ;;  %v1292_v15 = vld [vmem:[%s1991_s8] ss:$0 sm:$0xff]  ;;  %s1685_s8 = smov [#allocation6]  }
0x1020   :  { %v801_v16 = vpop.permute.xlu0 %800 }
0x1021   :  { %v803_v17 = vmul.f32 %v1599_v8, %v801_v16 }
0x1023   :  { %805 = vrot.lane.b32.xlu1 %v803_v17, %s1683_s3 }
0x1095   :  { %v806_v18 = vpop.permute.xlu1 %805 }
0x1096   :  { %1445 = vmatmul.mubr.msk.f32.vlgmr.msra.gmra.mrb[12].mxu0 %vm205_vm2, %v806_v18 }
0x1097   :  { %1466 = vmatprep.mubr.msk.f32.mxu0 %vm1680_vm0, %v1681_v2  ;;  %1534 = vmatpush3.bf16.msra.mxu0 %v1533_v50 }
0x1098   :  { %1535 = vmatprep.subr.bf16.mxu0 %v1679_v1 }
0x109b   :  { %1537 = vmatpush3.bf16.msra.mxu0 %v1536_v52 }
0x1169   :  { %v875_v20 = vpop.f32.mrb[12].mxu0 }
0x116a   :  { %v879_v21 = vadd.f32 %v875_v20, %v193_v19  ;;  %v1446_v22 = vpop.f32.mrb[13].mxu0 }
0x116c   :  { %1602 = vtanh.f32 %v879_v21  ;;  %v1283_v24 = vmul.f32 -1.442695, %v879_v21 }
0x116e   :  { %1604 = vpow2.f32 %v1283_v24 }
0x1176   :  { %v1603_v23 = vpop.eup %1602 }
0x1177   :  { %889 = vrot.lane.b32.xlu0 %v1603_v23, %s1682_s20 }
0x1178   :  { %v1605_v25 = vpop.eup %1604 }
0x1179   :  { %v883_v26 = vadd.f32 1.0, %v1605_v25 }
0x117b   :  { %1606 = vrcp.f32 %v883_v26 }
0x1185   :  { %v1607_v27 = vpop.eup %1606 }
0x1186   :  { %v887_v30 = vmul.f32 %v1607_v27, %v797_v60 }
0x11e9   :  { %v890_v28 = vpop.permute.xlu0 %889 }
0x11ea   :  { %v892_v29 = vmul.f32 %v1607_v27, %v890_v28 }
0x11ec   :  { %894 = vrot.lane.b32.xlu1 %v892_v29, %s1683_s3 }
0x125e   :  { %v895_v31 = vpop.permute.xlu1 %894 }
0x125f   :  { %v897_v63 = vadd.f32 %v895_v31, %v887_v30 }
0x1261   :  { %1608 = vtanh.f32 %v897_v63 }
0x126b   :  { %v1609_v32 = vpop.eup %1608 }
0x126c   :  { %900 = vrot.lane.b32.xlu0 %v1609_v32, %s1682_s20  ;;  %v1293_v32 = vld [vmem:[#allocation2] ss:$0 sm:$0xff] }
0x12de   :  { %v901_v33 = vpop.permute.xlu0 %900 }
0x12df   :  { %v903_v34 = vmul.f32 %v1607_v27, %v901_v33 }
0x12e1   :  { %905 = vrot.lane.b32.xlu1 %v903_v34, %s1683_s3 }
0x1353   :  { %v906_v35 = vpop.permute.xlu1 %905 }
0x1354   :  { %1456 = vmatmul.mubr.msk.f32.vlgmr.msra.gmra.mrb[8].mxu1 %vm205_vm2, %v906_v35 }
0x1355   :  { %1477 = vmatprep.mubr.msk.f32.mxu1 %vm1680_vm0, %v1681_v2  ;;  %1540 = vmatpush3.bf16.msra.mxu1 %v1539_v59 }
0x1356   :  { %1541 = vmatprep.subr.bf16.mxu1 %v1679_v1  ;;  %v1289_v1 = vld [vmem:[%s1990_s7] ss:$0 sm:$0xff]  ;;  %s1684_s7 = smov 96  }
0x1359   :  { %1543 = vmatpush3.bf16.msra.mxu1 %v1542_v3 }
0x1427   :  { %v975_v37 = vpop.f32.mrb[8].mxu1 }
0x1428   :  { %v979_v38 = vadd.f32 %v975_v37, %v198_v36  ;;  %v1457_v39 = vpop.f32.mrb[9].mxu1 }
0x142a   :  { %1610 = vtanh.f32 %v979_v38  ;;  %v1285_v41 = vmul.f32 -1.442695, %v979_v38 }
0x142c   :  { %1612 = vpow2.f32 %v1285_v41 }
0x1434   :  { %v1611_v40 = vpop.eup %1610 }
0x1435   :  { %989 = vrot.lane.b32.xlu0 %v1611_v40, %s1682_s20 }
0x1436   :  { %v1613_v42 = vpop.eup %1612 }
0x1437   :  { %v983_v43 = vadd.f32 1.0, %v1613_v42 }
0x1439   :  { %1614 = vrcp.f32 %v983_v43 }
0x1443   :  { %v1615_v44 = vpop.eup %1614 }
0x1444   :  { %v987_v2 = vmul.f32 %v1615_v44, %v897_v63 }
0x14a7   :  { %v990_v45 = vpop.permute.xlu0 %989 }
0x14a8   :  { %v992_v46 = vmul.f32 %v1615_v44, %v990_v45 }
0x14aa   :  { %994 = vrot.lane.b32.xlu1 %v992_v46, %s1683_s3 }
0x151c   :  { %v995_v47 = vpop.permute.xlu1 %994 }
0x151d   :  { %v997_v14 = vadd.f32 %v995_v47, %v987_v2 }
0x151f   :  { %1616 = vtanh.f32 %v997_v14 }
0x1529   :  { %v1617_v53 = vpop.eup %1616 }
0x152a   :  { %1000 = vrot.lane.b32.xlu0 %v1617_v53, %s1682_s20 }
0x159c   :  { %v1001_v54 = vpop.permute.xlu0 %1000 }
0x159d   :  { %v1003_v55 = vmul.f32 %v1615_v44, %v1001_v54 }
0x159f   :  { %1016 = vrot.lane.b32.xlu1 %v1003_v55, %s1683_s3 }
0x15a3   :  { %1187 = vrot.lane.b32.xlu1 %v1003_v55, %s1682_s20 }
0x15a7   :  { %1207 = vrot.lane.b32.xlu1 %v1292_v15, %s1683_s3 }
0x1611   :  { %v1017_v56 = vpop.permute.xlu1 %1016 }
0x1612   :  { %1467 = vmatmul.mubr.msk.f32.vlgmr.msra.gmra.mrb[14].mxu0 %vm205_vm2, %v1017_v56 }
0x1615   :  { %v1188_v23 = vpop.permute.xlu1 %1187 }
0x1619   :  { %v1208_v26 = vpop.permute.xlu1 %1207 }
0x16e5   :  { %v1086_v5 = vpop.f32.mrb[14].mxu0 }
0x16e6   :  { %v1087_v9 = vadd.f32 %v1286_v4, %v1086_v5  ;;  %v1468_v6 = vpop.f32.mrb[15].mxu0 }
0x16e8   :  { %1618 = vtanh.f32 %v1087_v9  ;;  %v1288_v17 = vmul.f32 -1.442695, %v1087_v9 }
0x16f2   :  { %v1619_v7 = vpop.eup %1618 }
0x16f3   :  { %1226 = vst.msk [vmem:[#allocation6] sm:$0xff] %vm205_vm2, %v1619_v7  ;;  %1478 = vmatmul.mubr.msk.f32.vlgmr.msra.gmra.mrb[10].mxu1 %vm205_vm2, %v1619_v7 }
0x17c6   :  { %v1177_v8 = vpop.f32.mrb[10].mxu1 }
0x17c7   :  { %v1178_v10 = vadd.f32 %v1289_v1, %v1177_v8  ;;  %v1479_v13 = vpop.f32.mrb[11].mxu1 }
0x17c9   :  { %v1291_v11 = vmul.f32 -1.442695, %v1178_v10 }
0x17cb   :  { %1620 = vpow2.f32 %v1291_v11 }
0x17d5   :  { %v1621_v12 = vpop.eup %1620 }
0x17d6   :  { %v1184_v60 = vadd.f32 1.0, %v1621_v12 }
0x17d8   :  { %1622 = vrcp.f32 %v1184_v60 }
0x17d9   :  { %1624 = vpow2.f32 %v1288_v17 }
0x17e2   :  { %v1623_v16 = vpop.eup %1622 }
0x17e3   :  { %1192 = vrot.lane.b32.xlu0 %v1623_v16, %s1682_s20  ;;  %v1625_v18 = vpop.eup %1624  ;;  %s1253_s20 = sshll.u32 %s1685_s8, 4  ;;  %s1254_s20 = int_to_ptr.vmem [resolvable:$true] %s1253_s20 }
0x17e4   :  { %v1093_v19 = vadd.f32 1.0, %v1625_v18  ;;  %s1650_s28 = scalar_lea.vmem %s1254_s20, 256  ;;  %p1655_p9 = scmp.lt.s32.totalorder %s1254_s20, %s1254_s20 }
0x17e5   :  { %p1651_p8 = scmp.ne.s32.totalorder %s1254_s20, %s1650_s28  ;;  %p1656_p10 = scmp.lt.s32.totalorder %s1650_s28, %s1650_s28 }
0x17e6   :  { %1626 = vrcp.f32 %v1093_v19 }
0x17e7   :  { %p1657_p11 = por %p1656_p10, %p1655_p9 }
0x17e9   :  { %p1658_p12 = pnand %p1657_p11, %p1651_p8 }
0x17f0   :  { %v1627_v20 = vpop.eup %1626 }
0x17f1   :  { %v1190_v24 = vmul.f32 %v1627_v20, %v1188_v23 }
0x1855   :  { %v1193_v21 = vpop.permute.xlu0 %1192 }
0x1856   :  { %v1195_v22 = vmul.f32 %v1627_v20, %v1193_v21 }
0x1858   :  { %1197 = vrot.lane.b32.xlu0 %v1195_v22, %s1684_s7 }
0x18ca   :  { %v1198_v25 = vpop.permute.xlu0 %1197 }
0x18cb   :  { %v1200_v27 = vadd.f32 %v1198_v25, %v1190_v24 }
0x18cd   :  { %v1210_v28 = vmul.f32 %v1208_v26, %v1200_v27 }
0x18cf   :  { %1212 = vrot.lane.b32.xlu0 %v1210_v28, %s1684_s7 }
0x18d3   :  { %1227 = vrot.lane.b32.xlu0 %v1623_v16, %s1683_s3 }
0x18d7   :  { %1233 = vrot.lane.b32.xlu0 %v1627_v20, %s1683_s3 }
0x1941   :  { %v1213_v29 = vpop.permute.xlu0 %1212 }
0x1942   :  { %v1215_v30 = vsel %vm205_vm2, %v1213_v29, 0.0 }
0x1943   :  { %1216 = vadd.xlane.f32.xlu1 %v1215_v30 }
0x1945   :  { %v1228_v31 = vpop.permute.xlu0 %1227 }
0x1946   :  { %1231 = vst.msk [vmem:[#allocation6] sm:$0xff] %vm1230_vm3, %v1228_v31 }
0x1949   :  { %v1234_v63 = vpop.permute.xlu0 %1233 }
0x194a   :  { %1237 = vst.msk [vmem:[#allocation6] sm:$0xff] %vm1236_vm4, %v1234_v63 }
0x194b   :  { %1240 = vst.msk [vmem:[#allocation6 + $0x8] sm:$0xff] %vm205_vm2, %v1234_v63 }
0x194c   :  { %1239 = vst.msk [vmem:[#allocation6] sm:$0xff] %vm1238_vm5, %v1234_v63 }
0x19d0   :  { %v1217_v33 = vpop.xlane.xlu1 %1216 }
0x19d1   :  { %v1225_v34 = vadd.f32 %v1293_v32, %v1217_v33 }
0x19d3   :  { %1242 = vrot.lane.b32.xlu0 %v1225_v34, %s1683_s3 }
0x1a45   :  { %v1243_v35 = vpop.permute.xlu0 %1242 }
0x1a46   :  { %1246 = vst.msk [vmem:[#allocation6 + $0x8] sm:$0xff] %vm1245_vm6, %v1243_v35 }
0x1a47   :  { %1661 = shalt.err (!%p1658_p12)
}
0x1a48   :  { %s1662_s30 = scalar_lea.hbm %s1993_s10, 256 }
0x1a49   :  { %p1663_p13 = scmp.ne.s32.totalorder %s1993_s10, %s1662_s30  ;;  %p1666_p0 = scmp.lt.u32.totalorder %s1662_s30, %s1993_s10 }
0x1a4b   :  { %p1668_p1 = pnand %p1666_p0, %p1663_p13 }
0x1a4d   :  { %1671 = shalt.err (!%p1668_p1)
}
0x1a4e   :  { %1256 = dma.vmem_to_hbm [thread:$0]  %s1254_s20, 256, %s1993_s10, [#allocation5]  }
0x1a4f   :  { %1674 = dma.done.wait [#allocation5], 256  }
0x1a50   :  { %1675 = vsyncadd [#allocation5], 4294967040 }
0x1a51   :  { %1260 = vsyncpa [#allocation4], 1 }
0x1a52   :  { %1261 = vsyncpa [#allocation5], 1 }

</bundles_post_ra>
